<compile_context>
chip_gen: v7x
topology: tpu7x:2x2x1
jax: 0.10.0
libtpu: 0.0.40
codegen_flags: <defaults>
</compile_context>

<pallas_src>
import functools

import jax
import jax.numpy as jnp
from jax import lax
from jax.experimental import pallas as pl
from jax.experimental.pallas import tpu as pltpu


def _round_up(x, m):
    return (x + m - 1) // m * m


def _kld_kernel(*refs, branch, n_rows, ragged):
    """One grid step over a dense (tile_rows, 128) tile of each statistic."""
    out_ref = refs[-1]
    # Native-dtype transport (bf16 halves HBM bytes); f32 math in-kernel
    # (v5e has no bf16 VPU/EUP).  TODO(synk): optionally keep bf16 math on
    # v6e/v7x via pltpu.get_tpu_info once the kernel is HBM-bound anyway.
    xs = [r[...].astype(jnp.float32) for r in refs[:-1]]

    if branch == "both":
        mu1, lv1, mu2, lv2 = xs
        dlv = lv1 - lv2
        dmu = mu1 - mu2
        # == 1 + lv1 - lv2 - (exp(lv1) + (mu1-mu2)^2)/exp(lv2), divide-free:
        # two independent EUP exps, no Newton-reciprocal chain on the VPU.
        term = 1.0 + dlv - jnp.exp(dlv) - dmu * dmu * jnp.exp(-lv2)
    elif branch == "posterior":          # mu2 is None
        mu1, lv1 = xs
        term = 1.0 + lv1 - (jnp.exp(lv1) + mu1 * mu1)
    else:                                # "prior": mu1 is None
        mu2, lv2 = xs
        term = 1.0 - lv2 - (1.0 + mu2 * mu2) * jnp.exp(-lv2)

    tile_rows = term.shape[0]
    if ragged:
        # Only the last tile overhangs the (R, 128) array; its out-of-bounds
        # rows contain unspecified VMEM data.  Any inf/NaN that garbage
        # produces through exp() is discarded by the select below (select
        # does not propagate from the unchosen branch).  Full tiles pass the
        # predicate trivially, so no pl.when split is needed.
        i = pl.program_id(0)
        row = lax.broadcasted_iota(jnp.int32, term.shape, 0) + i * tile_rows
        term = jnp.where(row < n_rows, term, 0.0)

    # (tile_rows, 128) -> (tile_rows//8, 8, 128) groups whole (8,128) vregs,
    # so this reduce is pure VPU adds.  The single cross-lane reduce happens
    # once in the wrapper on the tiny (G, 8, 128) partials array.
    out_ref[0] = term.reshape(tile_rows // 8, 8, 128).sum(axis=0)


def kl_divergence(mu1=None, logvar1=None, mu2=None, logvar2=None, *,
                  block_rows=2048):
    """Pallas TPU port of KLDivergence.forward (returns a 0-d scalar loss)."""
    if mu1 is None and mu2 is None:
        # PyTorch returns torch.zeros(1) here (shape (1,)) but 0-d scalars on
        # every other path; we normalize to a 0-d scalar for consistency.
        return jnp.zeros((), jnp.float32)

    if mu2 is None:
        branch, stats, lead = "posterior", (mu1, logvar1), mu1
    elif mu1 is None:
        branch, stats, lead = "prior", (mu2, logvar2), mu2
    else:
        branch, stats, lead = "both", (mu1, logvar1, mu2, logvar2), mu1

    assert block_rows % 8 == 0, "block_rows must be a multiple of 8"

    n = lead.size
    # mean(sum(term, dim=1)) == sum(term) / (size / shape[1])  (any rank >= 2).
    denom = n // lead.shape[1]

    # Lane-dense layout: flatten each stat and view it as (R, 128) with R a
    # multiple of 8.  The reshape is a free bitcast when n is already a
    # multiple of 1024; the conditional zero padding is exact because
    # term(mu=0, logvar=0) == 0 in every branch.
    n_pad = _round_up(n, 8 * 128)
    n_rows = n_pad // 128

    def as_tiles(x):
        flat = x.reshape(-1)
        if n_pad != n:
            flat = jnp.pad(flat, (0, n_pad - n))
        return flat.reshape(n_rows, 128)

    tiles = [as_tiles(s) for s in stats]

    tile_rows = min(block_rows, n_rows)          # both are multiples of 8
    num_tiles = pl.cdiv(n_rows, tile_rows)
    ragged = (n_rows % tile_rows) != 0           # only possible when > 1 tile

    kernel = functools.partial(
        _kld_kernel, branch=branch, n_rows=n_rows, ragged=ragged)

    n_exp = 2 if branch == "both" else 1
    itemsize = tiles[0].dtype.itemsize
    cost = pl.CostEstimate(
        flops=8 * n_pad,
        transcendentals=n_exp * n_pad,
        bytes_accessed=len(tiles) * n_pad * itemsize + num_tiles * 8 * 128 * 4,
    )

    partials = pl.pallas_call(
        kernel,
        out_shape=jax.ShapeDtypeStruct((num_tiles, 8, 128), jnp.float32),
        grid_spec=pltpu.PrefetchScalarGridSpec(
            num_scalar_prefetch=0,
            grid=(num_tiles,),
            in_specs=[pl.BlockSpec((tile_rows, 128), lambda i: (i, 0))
                      for _ in tiles],
            out_specs=pl.BlockSpec((1, 8, 128), lambda i: (i, 0, 0)),
        ),
        compiler_params=pltpu.CompilerParams(
            # No carried state -> independent tiles; both v7x TCs can be used.
            dimension_semantics=("parallel",),
            # 4 stats x 1 MiB f32 x 2 buffers = 8 MiB << 32 MiB scoped limit.
            vmem_limit_bytes=32 * 1024 * 1024,
        ),
        cost_estimate=cost,
    )(*tiles)

    # Tiny finalize in XLA: one reduce over (num_tiles, 8, 128) partials.
    return jnp.float32(-0.5 / denom) * jnp.sum(partials)


def _reference(mu1, lv1, mu2, lv2):
    """Pure-JAX reference mirroring the PyTorch module."""
    if mu2 is None:
        if mu1 is None:
            return jnp.zeros((), jnp.float32)
        term = 1.0 + lv1 - (jnp.exp(lv1) + mu1 ** 2)
    elif mu1 is None:
        term = 1.0 - lv2 - (1.0 + mu2 ** 2) / jnp.exp(lv2)
    else:
        term = 1.0 + lv1 - lv2 - (jnp.exp(lv1) + (mu1 - mu2) ** 2) / jnp.exp(lv2)
    term = term.astype(jnp.float32)
    return -0.5 * jnp.mean(jnp.sum(term, axis=1))


if __name__ == "__main__":
    key = jax.random.PRNGKey(0)

    def make(k, b, z):
        ks = jax.random.split(k, 4)
        mu1 = jax.random.normal(ks[0], (b, z), jnp.float32)
        lv1 = 0.1 * jax.random.normal(ks[1], (b, z), jnp.float32)
        mu2 = jax.random.normal(ks[2], (b, z), jnp.float32)
        lv2 = 0.1 * jax.random.normal(ks[3], (b, z), jnp.float32)
        return mu1, lv1, mu2, lv2

    k1, k2, k3 = jax.random.split(key, 3)

    # 1) both-present branch, f32, single tile (B*Z = 256 -> padded to 1024).
    mu1, lv1, mu2, lv2 = make(k1, 8, 32)
    got = kl_divergence(mu1, lv1, mu2, lv2)
    jax.block_until_ready(got)
    want = _reference(mu1, lv1, mu2, lv2)
    assert jnp.allclose(got, want, rtol=1e-5, atol=1e-4), (got, want)

    # 2) bf16 transport (cast in-kernel), compared against f32 math on the
    #    same bf16-rounded values.
    mu1h, lv1h, mu2h, lv2h = [a.astype(jnp.bfloat16) for a in (mu1, lv1, mu2, lv2)]
    got = kl_divergence(mu1h, lv1h, mu2h, lv2h)
    jax.block_until_ready(got)
    want = _reference(*[a.astype(jnp.float32) for a in (mu1h, lv1h, mu2h, lv2h)])
    assert jnp.allclose(got, want, rtol=1e-4, atol=1e-4), (got, want)

    # 3) multi-tile grid with lane padding AND a ragged last tile:
    #    B*Z = 2880 -> padded to 3072 -> R = 24 rows; block_rows=16 -> 2 tiles.
    mu1b, lv1b, mu2b, lv2b = make(k2, 8, 360)
    got = kl_divergence(mu1b, lv1b, mu2b, lv2b, block_rows=16)
    jax.block_until_ready(got)
    want = _reference(mu1b, lv1b, mu2b, lv2b)
    assert jnp.allclose(got, want, rtol=1e-5, atol=1e-4), (got, want)

    # 4) multi-tile grid, non-ragged (B*Z = 8192 -> R = 64, block_rows=32).
    mu1d, lv1d, mu2d, lv2d = make(k2, 16, 512)
    got = kl_divergence(mu1d, lv1d, mu2d, lv2d, block_rows=32)
    jax.block_until_ready(got)
    want = _reference(mu1d, lv1d, mu2d, lv2d)
    assert jnp.allclose(got, want, rtol=1e-5, atol=1e-4), (got, want)

    # 5) mu2 is None branch (posterior vs standard normal prior).
    mu1c, lv1c, _, _ = make(k3, 8, 32)
    got = kl_divergence(mu1c, lv1c)
    jax.block_until_ready(got)
    want = _reference(mu1c, lv1c, None, None)
    assert jnp.allclose(got, want, rtol=1e-5, atol=1e-4), (got, want)

    # 6) mu1 is None branch.
    got = kl_divergence(None, None, mu2, lv2)
    jax.block_until_ready(got)
    want = _reference(None, None, mu2, lv2)
    assert jnp.allclose(got, want, rtol=1e-5, atol=1e-4), (got, want)

    # 7) both None -> 0-d zero scalar.
    got = kl_divergence()
    jax.block_until_ready(got)
    assert got.shape == () and jnp.all(got == 0.0)

    print("KERNEL_OK")
</pallas_src>

<mosaic_0001>
module attributes {stable_mosaic.version = 11 : i64} {
  func.func @_kld_kernel(%arg0: i32, %arg1: memref<8x128xf32, #tpu.memory_space<vmem>>, %arg2: memref<8x128xf32, #tpu.memory_space<vmem>>, %arg3: memref<8x128xf32, #tpu.memory_space<vmem>>, %arg4: memref<8x128xf32, #tpu.memory_space<vmem>>, %arg5: memref<1x8x128xf32, #tpu.memory_space<vmem>>) attributes {dimension_semantics = [#tpu.dimension_semantics<parallel>], iteration_bounds = array<i64: 1>, scalar_prefetch = 0 : i64, scratch_operands = 0 : i64, tpu.core_type = #tpu.core_type<tc>, window_params = [{transform_indices = @transform_0, window_bounds = array<i64: 8, 128>}, {transform_indices = @transform_1, window_bounds = array<i64: 8, 128>}, {transform_indices = @transform_2, window_bounds = array<i64: 8, 128>}, {transform_indices = @transform_3, window_bounds = array<i64: 8, 128>}, {transform_indices = @transform_4, window_bounds = array<i64: 1, 8, 128>}]} {
    %c0 = arith.constant 0 : index
    %c0_0 = arith.constant 0 : index
    %0 = vector.load %arg1[%c0, %c0_0] : memref<8x128xf32, #tpu.memory_space<vmem>>, vector<8x128xf32>
    %c0_1 = arith.constant 0 : index
    %c0_2 = arith.constant 0 : index
    %1 = vector.load %arg2[%c0_1, %c0_2] : memref<8x128xf32, #tpu.memory_space<vmem>>, vector<8x128xf32>
    %c0_3 = arith.constant 0 : index
    %c0_4 = arith.constant 0 : index
    %2 = vector.load %arg3[%c0_3, %c0_4] : memref<8x128xf32, #tpu.memory_space<vmem>>, vector<8x128xf32>
    %c0_5 = arith.constant 0 : index
    %c0_6 = arith.constant 0 : index
    %3 = vector.load %arg4[%c0_5, %c0_6] : memref<8x128xf32, #tpu.memory_space<vmem>>, vector<8x128xf32>
    %4 = arith.subf %1, %3 : vector<8x128xf32>
    %5 = arith.subf %0, %2 : vector<8x128xf32>
    %cst = arith.constant 1.000000e+00 : f32
    %6 = vector.broadcast %cst : f32 to vector<8x128xf32>
    %7 = arith.addf %6, %4 : vector<8x128xf32>
    %8 = math.exp %4 : vector<8x128xf32>
    %9 = arith.subf %7, %8 : vector<8x128xf32>
    %10 = arith.mulf %5, %5 : vector<8x128xf32>
    %cst_7 = arith.constant 0.000000e+00 : f32
    %11 = vector.broadcast %cst_7 : f32 to vector<8x128xf32>
    %12 = arith.subf %11, %3 : vector<8x128xf32>
    %13 = math.exp %12 : vector<8x128xf32>
    %14 = arith.mulf %10, %13 : vector<8x128xf32>
    %15 = arith.subf %9, %14 : vector<8x128xf32>
    %16 = vector.shape_cast %15 : vector<8x128xf32> to vector<1x8x128xf32>
    %cst_8 = arith.constant dense<0.000000e+00> : vector<8x128xf32>
    %17 = vector.multi_reduction <add>, %16, %cst_8 [0] : vector<1x8x128xf32> to vector<8x128xf32>
    %c0_9 = arith.constant 0 : index
    %c0_10 = arith.constant 0 : index
    %c0_11 = arith.constant 0 : index
    %18 = vector.load %arg5[%c0_9, %c0_10, %c0_11] : memref<1x8x128xf32, #tpu.memory_space<vmem>>, vector<1x8x128xf32>
    %19 = vector.shape_cast %18 : vector<1x8x128xf32> to vector<8x128xf32>
    %20 = vector.shape_cast %17 : vector<8x128xf32> to vector<1x8x128xf32>
    tpu.vector_store %arg5[%c0_9, %c0_10, %c0_11], %20 {strides = array<i32>} : memref<1x8x128xf32, #tpu.memory_space<vmem>>, vector<1x8x128xf32>,
    return
  }
  func.func @transform_0(%arg0: i32) -> (i32, i32) {
    %c0_i32 = arith.constant 0 : i32
    %c0_i32_0 = arith.constant 0 : i32
    return %arg0, %c0_i32 : i32, i32
  }
  func.func @transform_1(%arg0: i32) -> (i32, i32) {
    %c0_i32 = arith.constant 0 : i32
    %c0_i32_0 = arith.constant 0 : i32
    return %arg0, %c0_i32 : i32, i32
  }
  func.func @transform_2(%arg0: i32) -> (i32, i32) {
    %c0_i32 = arith.constant 0 : i32
    %c0_i32_0 = arith.constant 0 : i32
    return %arg0, %c0_i32 : i32, i32
  }
  func.func @transform_3(%arg0: i32) -> (i32, i32) {
    %c0_i32 = arith.constant 0 : i32
    %c0_i32_0 = arith.constant 0 : i32
    return %arg0, %c0_i32 : i32, i32
  }
  func.func @transform_4(%arg0: i32) -> (i32, i32, i32) {
    %c0_i32 = arith.constant 0 : i32
    %c0_i32_0 = arith.constant 0 : i32
    %c0_i32_1 = arith.constant 0 : i32
    return %arg0, %c0_i32, %c0_i32_0 : i32, i32, i32
  }
}

</mosaic_0001>

<bundles_post_ra>
// kernel: tpu_custom_call.1
= control target key start
LH: loop header
LB: loop body
LE: loop exit
PB: predicated region body
PF: predicated region fallthrough
CT: control target
= control target key end

     0   :  { %9 = vsyncpa [#allocation3], 0  ;;  %s269_s0 = inlined_call_operand.hbm [shape: f32[8,128], index: 0, kind: input, shape index: {}]   ;;  %s270_s1 = inlined_call_operand.hbm [shape: f32[8,128], index: 1, kind: input, shape index: {}]   ;;  %s271_s2 = inlined_call_operand.hbm [shape: f32[8,128], index: 2, kind: input, shape index: {}]   ;;  %s272_s3 = inlined_call_operand.vmem [shape: f32[8,128], index: 3, kind: input, shape index: {}]   ;;  %s273_s4 = inlined_call_operand.hbm [shape: f32[1,8,128], index: 4, kind: output, shape index: {}]  }
   0x1   :  { %10 = vsyncpa [#allocation6], 0 }
   0x2   :  { %11 = vsyncpa [#allocation4], 0  ;;  %s189_s15 = smov [#allocation5]   ;;  %s190_s17 = smov [#allocation2]  }
   0x3   :  { %s28_s16 = sshll.u32 %s189_s15, 4  ;;  %s18_s18 = sshll.u32 %s190_s17, 4  ;;  %s29_s16 = int_to_ptr.vmem [resolvable:$true] %s28_s16  ;;  %s19_s18 = int_to_ptr.vmem [resolvable:$true] %s18_s18 }
   0x4   :  { %s95_s21 = scalar_lea.hbm %s270_s1, 128 }
   0x5   :  { %p96_p0 = scmp.ne.s32.totalorder %s270_s1, %s95_s21  ;;  %p99_p1 = scmp.lt.u32.totalorder %s95_s21, %s270_s1 }
   0x7   :  { %p101_p2 = pnand %p99_p1, %p96_p0 }
   0x9   :  { %104 = shalt.err (!%p101_p2)
}
   0xa   :  { %s105_s26 = scalar_lea.vmem %s29_s16, 128  ;;  %p110_p4 = scmp.lt.s32.totalorder %s29_s16, %s29_s16 }
   0xb   :  { %p106_p3 = scmp.ne.s32.totalorder %s29_s16, %s105_s26  ;;  %p111_p5 = scmp.lt.s32.totalorder %s105_s26, %s105_s26 }
   0xd   :  { %p112_p6 = por %p111_p5, %p110_p4 }
   0xf   :  { %p113_p7 = pnand %p112_p6, %p106_p3 }
  0x11   :  { %116 = shalt.err (!%p113_p7)
}
  0x12   :  { %31 = dma.hbm_to_vmem [thread:$0]  %s270_s1, 128, %s29_s16, [#allocation6]  }
  0x13   :  { %s117_s5 = scalar_lea.hbm %s269_s0, 128 }
  0x14   :  { %p118_p8 = scmp.ne.s32.totalorder %s269_s0, %s117_s5  ;;  %p121_p9 = scmp.lt.u32.totalorder %s117_s5, %s269_s0 }
  0x16   :  { %p123_p10 = pnand %p121_p9, %p118_p8 }
  0x18   :  { %126 = shalt.err (!%p123_p10)
}
  0x19   :  { %s127_s10 = scalar_lea.vmem %s19_s18, 128  ;;  %p132_p12 = scmp.lt.s32.totalorder %s19_s18, %s19_s18 }
  0x1a   :  { %p128_p11 = scmp.ne.s32.totalorder %s19_s18, %s127_s10  ;;  %p133_p13 = scmp.lt.s32.totalorder %s127_s10, %s127_s10 }
  0x1c   :  { %p134_p0 = por %p133_p13, %p132_p12 }
  0x1e   :  { %p135_p1 = pnand %p134_p0, %p128_p11 }
  0x20   :  { %138 = shalt.err (!%p135_p1)
}
  0x21   :  { %21 = dma.hbm_to_vmem [thread:$0]  %s269_s0, 128, %s19_s18, [#allocation3]  }
  0x22   :  { %s191_s12 = smov [#allocation7]   ;;  %s139_s16 = scalar_lea.hbm %s271_s2, 128 }
  0x23   :  { %s38_s13 = sshll.u32 %s191_s12, 4  ;;  %p140_p2 = scmp.ne.s32.totalorder %s271_s2, %s139_s16  ;;  %s39_s13 = int_to_ptr.vmem [resolvable:$true] %s38_s13 }
  0x24   :  { %p143_p3 = scmp.lt.u32.totalorder %s139_s16, %s271_s2 }
  0x26   :  { %p145_p4 = pnand %p143_p3, %p140_p2 }
  0x28   :  { %148 = shalt.err (!%p145_p4)
}
  0x29   :  { %s149_s22 = scalar_lea.vmem %s39_s13, 128  ;;  %p154_p6 = scmp.lt.s32.totalorder %s39_s13, %s39_s13 }
  0x2a   :  { %p150_p5 = scmp.ne.s32.totalorder %s39_s13, %s149_s22  ;;  %p155_p7 = scmp.lt.s32.totalorder %s149_s22, %s149_s22 }
  0x2c   :  { %p156_p8 = por %p155_p7, %p154_p6 }
  0x2e   :  { %p157_p9 = pnand %p156_p8, %p150_p5 }
  0x30   :  { %160 = shalt.err (!%p157_p9)
}
  0x31   :  { %41 = dma.hbm_to_vmem [thread:$0]  %s271_s2, 128, %s39_s13, [#allocation6]  }
  0x32   :  { %183 = dma.done.wait [#allocation3], 128  }
  0x33   :  { %184 = vsyncadd [#allocation3], 4294967168 }
  0x34   :  { %185 = dma.done.wait [#allocation6], 256  }
  0x35   :  { %186 = vsyncadd [#allocation6], 4294967040  ;;  %v54_v0 = vld [vmem:[#allocation5] sm:$0xff]  ;;  %v56_v1 = vld [vmem:[%s272_s3] sm:$0xff]  ;;  %s192_s2 = smov [#allocation8]  }
  0x36   :  { %v57_v2 = vsub.f32 %v54_v0, %v56_v1  ;;  %v64_v3 = vsub.f32 0.0, %v56_v1  ;;  %v53_v6 = vld [vmem:[#allocation2] sm:$0xff]  ;;  %v55_v7 = vld [vmem:[#allocation7] sm:$0xff]  ;;  %s77_s25 = sshll.u32 %s192_s2, 4  ;;  %s78_s25 = int_to_ptr.vmem [resolvable:$true] %s77_s25 }
  0x37   :  { %v58_v8 = vsub.f32 %v53_v6, %v55_v7  ;;  %s161_s3 = scalar_lea.vmem %s78_s25, 128  ;;  %p166_p11 = scmp.lt.s32.totalorder %s78_s25, %s78_s25 }
  0x38   :  { %v60_v4 = vmul.f32 1.442695, %v57_v2  ;;  %v65_v5 = vmul.f32 1.442695, %v64_v3  ;;  %v59_v9 = vadd.f32 1.0, %v57_v2  ;;  %p162_p10 = scmp.ne.s32.totalorder %s78_s25, %s161_s3  ;;  %p167_p12 = scmp.lt.s32.totalorder %s161_s3, %s161_s3 }
  0x39   :  { %v63_v10 = vmul.f32 %v58_v8, %v58_v8 }
  0x3a   :  { %91 = vpow2.f32 %v60_v4  ;;  %p168_p13 = por %p167_p12, %p166_p11 }
  0x3b   :  { %93 = vpow2.f32 %v65_v5 }
  0x3c   :  { %p169_p0 = pnand %p168_p13, %p162_p10 }
  0x44   :  { %v92_v11 = vpop.eup %91 }
  0x45   :  { %v94_v12 = vpop.eup %93  ;;  %v62_v13 = vsub.f32 %v59_v9, %v92_v11 }
  0x46   :  { %v67_v14 = vmul.f32 %v94_v12, %v63_v10 }
  0x48   :  { %v68_v15 = vsub.f32 %v62_v13, %v67_v14 }
  0x4a   :  { %70 = vst [vmem:[#allocation8] sm:$0xff] %v68_v15 }
  0x4b   :  { %172 = shalt.err (!%p169_p0)
}
  0x4c   :  { %s173_s28 = scalar_lea.hbm %s273_s4, 128 }
  0x4d   :  { %p174_p1 = scmp.ne.s32.totalorder %s273_s4, %s173_s28  ;;  %p177_p2 = scmp.lt.u32.totalorder %s173_s28, %s273_s4 }
  0x4f   :  { %p179_p3 = pnand %p177_p2, %p174_p1 }
  0x51   :  { %182 = shalt.err (!%p179_p3)
}
  0x52   :  { %80 = dma.vmem_to_hbm [thread:$0]  %s78_s25, 128, %s273_s4, [#allocation4]  }
  0x53   :  { %187 = dma.done.wait [#allocation4], 128  }
  0x54   :  { %188 = vsyncadd [#allocation4], 4294967168 }
  0x55   :  { %84 = vsyncpa [#allocation3], 1 }
  0x56   :  { %85 = vsyncpa [#allocation6], 1 }
  0x57   :  { %86 = vsyncpa [#allocation4], 1 }

</bundles_post_ra>
